<compile_context>
chip_gen: v6e
topology: v6e:2x2x1
jax: 0.10.0
libtpu: 0.0.40
codegen_flags: <defaults>
</compile_context>

<pallas_src>
import math

import jax
import jax.numpy as jnp
from jax import lax
from jax.experimental import pallas as pl
from jax.experimental.pallas import tpu as pltpu


VMEM_LIMIT_BYTES = 32 * 1024 * 1024   # safe on v5e/v6e (128 MiB phys) and v7x (64 MiB)


# ------------------------------ tiling helpers ------------------------------

def _ceil_to(n, m):
    return ((n + m - 1) // m) * m


def _tile(n, unit, max_tile):
    """Pick a tile (multiple of `unit`, <= max_tile) and the padded extent it divides."""
    assert max_tile % unit == 0
    t = max_tile if n >= max_tile else _ceil_to(n, unit)
    return t, _ceil_to(n, t)


def _spec_lane_tile(mt, cin, cout,
                    weight_tile_budget=2 * 1024 * 1024,
                    acc_vreg_budget=128 * 1024,
                    max_tile=2048):
    """Lane tile for the spectral kernel, bounded so
      - one packed (2*Cin*Cout, TM) f32 weight tile stays under `weight_tile_budget`
        (double-buffered working set fits all chips, incl. v7x's 64 MiB VMEM), and
      - the two (Cout, TM) f32 accumulators stay within ~half the 64x4KiB vreg file
        (no spill stores saturating the single vst slot on v5e)."""
    w_cap = max(128, (weight_tile_budget // max(8 * cin * cout, 1)) // 128 * 128)
    a_cap = max(128, (acc_vreg_budget // max(8 * cout, 1)) // 128 * 128)
    return _tile(mt, 128, min(max_tile, w_cap, a_cap))


# ----------------------------- Pallas kernels ------------------------------

def _spec_mul_kernel(x_ref, w_ref, o_ref):
    """Complex channel mix for one (mode-tile, batch) block.

    Packed layouts (real rows first, imag rows second along the sublane axis):
      x_ref: (1, 2*Cin,      TM)   rows [0:Cin] = Re(x), [Cin:2Cin] = Im(x)
      w_ref: (2*Cin*Cout,    TM)   rows [0:Cin*Cout] = Re(w), rest = Im(w),
                                   row index within a half = i*Cout + o
      o_ref: (1, 2*Cout,     TM)   rows [0:Cout] = Re(out), rest = Im(out)
    out[o, m] = sum_i x[i, m] * w[i, o, m]  (complex), as an FMA accumulation
    over Cin; live data is only the two (Cout, TM) f32 accumulators.
    """
    _, cin2, tm = x_ref.shape
    cin = cin2 // 2
    cout = o_ref.shape[1] // 2
    cw = cin * cout

    def fma(accr, acci, xr, xi, wr, wi):
        # hoist the sublane broadcasts once per i (JAX does not CSE broadcast_in_dim)
        xrb = jnp.broadcast_to(xr, (cout, tm))
        xib = jnp.broadcast_to(xi, (cout, tm))
        accr = accr + (xrb * wr - xib * wi)
        acci = acci + (xrb * wi + xib * wr)
        return accr, acci

    accr = jnp.zeros((cout, tm), jnp.float32)
    acci = jnp.zeros((cout, tm), jnp.float32)

    if cin <= 8:
        # small Cin: static unroll (tight schedule, no trip-count overhead)
        for i in range(cin):
            xr = x_ref[0, i:i + 1, :]
            xi = x_ref[0, cin + i:cin + i + 1, :]
            wr = w_ref[i * cout:(i + 1) * cout, :]
            wi = w_ref[cw + i * cout:cw + (i + 1) * cout, :]
            accr, acci = fma(accr, acci, xr, xi, wr, wi)
    else:
        # large Cin: visible loop keeps accumulator live ranges tight;
        # partial unroll still gives the LLO scheduler ILP.
        def body(i, carry):
            ar, ai = carry
            xr = x_ref[0, pl.ds(i, 1), :]
            xi = x_ref[0, pl.ds(cin + i, 1), :]
            r0 = pl.multiple_of(i * cout, cout)
            wr = w_ref[pl.ds(r0, cout), :]
            wi = w_ref[pl.ds(cw + r0, cout), :]
            return fma(ar, ai, xr, xi, wr, wi)
        accr, acci = lax.fori_loop(0, cin, body, (accr, acci), unroll=4)

    o_ref[0, :cout, :] = accr
    o_ref[0, cout:, :] = acci


def _conv1x1_kernel(x_ref, w_ref, b_ref, o_ref):
    """1x1x1 Conv3d as an MXU matmul: (Cout, Cin) @ (Cin, TN) + bias epilogue."""
    acc = jnp.dot(w_ref[...], x_ref[...], preferred_element_type=jnp.float32)
    o_ref[...] = acc + b_ref[...]              # bias (Cout, 1) broadcast over lanes


def _add_gelu_kernel(a_ref, b_ref, o_ref):
    """Fused (x1 + x2) followed by erf-based GELU (torch F.gelu default, using the
    Abramowitz & Stegun erf polynomial with an exact divide — mem-bound, so free)."""
    x = a_ref[...] + b_ref[...]
    z = x * jnp.float32(0.7071067811865476)
    az = jnp.abs(z)
    t = 1.0 / (1.0 + jnp.float32(0.3275911) * az)
    poly = t * (0.254829592 + t * (-0.284496736 + t * (1.421413741
               + t * (-1.453152027 + t * 1.061405429))))
    erf_abs = 1.0 - poly * jnp.exp(-az * az)
    erf = jnp.where(z >= 0, erf_abs, -erf_abs)
    o_ref[...] = 0.5 * x * (1.0 + erf)


# ------------------------------ Pallas wrappers -----------------------------

def pack_spectral_weights(w_spec):
    """Hoisted (call ONCE, outside jit): fold the static spectral weights
    (4, Cin, Cout, m1, m2, m3) complex64 into the packed real/imag lane-major
    layout (2*Cin*Cout, Mpad) float32 the kernel consumes."""
    G, Cin, Cout, m1, m2, m3 = w_spec.shape
    M = m1 * m2 * m3
    Mt = G * M
    TM, Mpad = _spec_lane_tile(Mt, Cin, Cout)
    w2 = jnp.transpose(w_spec.reshape(G, Cin, Cout, M), (1, 2, 0, 3)).reshape(Cin * Cout, Mt)
    wpk = jnp.concatenate([jnp.real(w2), jnp.imag(w2)], axis=0).astype(jnp.float32)
    if Mpad != Mt:
        wpk = jnp.pad(wpk, ((0, 0), (0, Mpad - Mt)))
    return wpk


def spectral_corner_mul(x_corners, w_pack, cin, cout):
    """x_corners: complex64 (4, B, Cin, m1, m2, m3); w_pack: f32 (2*Cin*Cout, Mpad)
    (from pack_spectral_weights). Returns complex64 (4, B, Cout, m1, m2, m3)."""
    G, B, Cin, m1, m2, m3 = x_corners.shape
    assert Cin == cin
    M = m1 * m2 * m3
    Mt = G * M
    TM, Mpad = _spec_lane_tile(Mt, cin, cout)
    assert w_pack.shape == (2 * cin * cout, Mpad)

    # Fold the 4 frequency corners + modes into one lane-dense trailing axis;
    # pack real/imag along the sublane axis (avoids the <8-sublane padding tax).
    x2 = jnp.transpose(x_corners.reshape(G, B, Cin, M), (1, 2, 0, 3)).reshape(B, Cin, Mt)
    xpk = jnp.concatenate([jnp.real(x2), jnp.imag(x2)], axis=1).astype(jnp.float32)
    if Mpad != Mt:
        xpk = jnp.pad(xpk, ((0, 0), (0, 0), (0, Mpad - Mt)))

    # Grid: mode tiles outer ("parallel" → sharded across TensorCores keeps
    # per-core weight residency), batch innermost ("arbitrary") → the weight
    # block index is unchanged across consecutive steps, so its HBM tile is
    # NOT re-fetched per batch.
    x_bs = pl.BlockSpec((1, 2 * cin, TM), lambda j, b: (b, 0, j))
    w_bs = pl.BlockSpec((2 * cin * cout, TM), lambda j, b: (0, j))
    o_bs = pl.BlockSpec((1, 2 * cout, TM), lambda j, b: (b, 0, j))

    opk = pl.pallas_call(
        _spec_mul_kernel,
        out_shape=jax.ShapeDtypeStruct((B, 2 * cout, Mpad), jnp.float32),
        grid=(Mpad // TM, B),
        in_specs=[x_bs, w_bs],
        out_specs=o_bs,
        compiler_params=pltpu.CompilerParams(
            dimension_semantics=("parallel", "arbitrary"),
            vmem_limit_bytes=VMEM_LIMIT_BYTES),
    )(xpk, w_pack)

    oc = lax.complex(opk[:, :cout, :Mt], opk[:, cout:, :Mt]).reshape(B, cout, G, M)
    return jnp.transpose(oc, (2, 0, 1, 3)).reshape(G, B, cout, m1, m2, m3)


def conv1x1_3d(x, w, b):
    """x: (B, Cin, D1, D2, D3); w: (Cout, Cin); b: (Cout,) -> (B, Cout, D1, D2, D3).
    Batch is folded into the lane axis: one mem-bound matmul stream."""
    B, Cin, D1, D2, D3 = x.shape
    Cout = w.shape[0]
    N = D1 * D2 * D3
    L = B * N
    TN, Lpad = _tile(L, 128, 4096)

    xf = jnp.transpose(x.reshape(B, Cin, N), (1, 0, 2)).reshape(Cin, L).astype(jnp.float32)
    if Lpad != L:
        xf = jnp.pad(xf, ((0, 0), (0, Lpad - L)))

    out = pl.pallas_call(
        _conv1x1_kernel,
        out_shape=jax.ShapeDtypeStruct((Cout, Lpad), jnp.float32),
        grid=(Lpad // TN,),
        in_specs=[
            pl.BlockSpec((Cin, TN), lambda j: (0, j)),
            pl.BlockSpec((Cout, Cin), lambda j: (0, 0)),
            pl.BlockSpec((Cout, 1), lambda j: (0, 0)),
        ],
        out_specs=pl.BlockSpec((Cout, TN), lambda j: (0, j)),
        compiler_params=pltpu.CompilerParams(
            dimension_semantics=("parallel",),
            vmem_limit_bytes=VMEM_LIMIT_BYTES),
    )(xf, w.astype(jnp.float32), b.reshape(Cout, 1).astype(jnp.float32))

    out = out[:, :L].reshape(Cout, B, N)
    return jnp.transpose(out, (1, 0, 2)).reshape(B, Cout, D1, D2, D3)


def add_gelu(a, b):
    """Elementwise (a + b) then GELU; a, b: (B, C, D1, D2, D3) float32."""
    B, C, D1, D2, D3 = a.shape
    R = B * C
    N = D1 * D2 * D3
    # (256, 2048) f32 tiles: 3 streams x 2 buffers x 2 MiB = 12 MiB, under the
    # explicit 32 MiB VMEM limit on every chip generation.
    TR, Rpad = _tile(R, 8, 256)
    TN, Npad = _tile(N, 128, 2048)

    af = a.reshape(R, N).astype(jnp.float32)
    bf = b.reshape(R, N).astype(jnp.float32)
    if (Rpad, Npad) != (R, N):
        pad = ((0, Rpad - R), (0, Npad - N))
        af = jnp.pad(af, pad)
        bf = jnp.pad(bf, pad)

    out = pl.pallas_call(
        _add_gelu_kernel,
        out_shape=jax.ShapeDtypeStruct((Rpad, Npad), jnp.float32),
        grid=(Rpad // TR, Npad // TN),
        in_specs=[pl.BlockSpec((TR, TN), lambda i, j: (i, j)),
                  pl.BlockSpec((TR, TN), lambda i, j: (i, j))],
        out_specs=pl.BlockSpec((TR, TN), lambda i, j: (i, j)),
        compiler_params=pltpu.CompilerParams(
            dimension_semantics=("parallel", "parallel"),
            vmem_limit_bytes=VMEM_LIMIT_BYTES),
    )(af, bf)
    return out[:R, :N].reshape(B, C, D1, D2, D3)


# --------------------------- parameter init + forward -----------------------

def init_params(key, in_codim, out_codim, m1, m2, m3):
    ks = jax.random.split(key, 6)
    scale = (1.0 / (2 * in_codim)) ** 0.5

    def complex_weight(k):
        kr, ki = jax.random.split(k)
        shape = (in_codim, out_codim, m1, m2, m3)
        return scale * (jax.random.normal(kr, shape, jnp.float32)
                        + 1j * jax.random.normal(ki, shape, jnp.float32))

    # weights1..4 stacked along leading axis -> (4, Cin, Cout, m1, m2, m3)
    w_spec = jnp.stack([complex_weight(ks[i]) for i in range(4)], axis=0)

    # Conv3d(in_codim, out_codim, 1): weight (out, in, 1, 1, 1) -> (out, in); bias (out,)
    bound = 1.0 / math.sqrt(in_codim)
    conv_w = jax.random.uniform(ks[4], (out_codim, in_codim), jnp.float32, -bound, bound)
    conv_b = jax.random.uniform(ks[5], (out_codim,), jnp.float32, -bound, bound)
    return w_spec, conv_w, conv_b


def operator_block_3d(x, w_pack, conv_w, conv_b, dim1, dim2, dim3, m1, m2, m3):
    """Matches OperatorBlock_3D.forward with Normalize=False, Non_Lin=True.
    `w_pack` is the pre-packed spectral weight from pack_spectral_weights()."""
    B, Cin = x.shape[0], x.shape[1]
    Cout = conv_w.shape[0]
    assert dim1 >= 2 * m1 and dim2 >= 2 * m2 and dim3 // 2 + 1 >= m3

    # ---------------- SpectralConv3d_Uno branch ----------------
    x_ft = jnp.fft.rfftn(x, axes=(-3, -2, -1), norm="forward")
    corners = jnp.stack([
        x_ft[:, :, :m1, :m2, :m3],
        x_ft[:, :, -m1:, :m2, :m3],
        x_ft[:, :, :m1, -m2:, :m3],
        x_ft[:, :, -m1:, -m2:, :m3],
    ], axis=0)
    oc = spectral_corner_mul(corners, w_pack, Cin, Cout)   # (4, B, Cout, m1, m2, m3)

    # Assemble the output spectrum with concat + pad (no four full-buffer scatters).
    D3h = dim3 // 2 + 1
    zmid1 = jnp.zeros((B, Cout, dim1 - 2 * m1, m2, m3), jnp.complex64)
    top = jnp.concatenate([oc[0], zmid1, oc[1]], axis=2)   # k2 <  m2 band
    bot = jnp.concatenate([oc[2], zmid1, oc[3]], axis=2)   # k2 >= dim2-m2 band
    zmid2 = jnp.zeros((B, Cout, dim1, dim2 - 2 * m2, m3), jnp.complex64)
    out_ft = jnp.concatenate([top, zmid2, bot], axis=3)    # (B, Cout, dim1, dim2, m3)
    out_ft = jnp.pad(out_ft, ((0, 0), (0, 0), (0, 0), (0, 0), (0, D3h - m3)))
    x1 = jnp.fft.irfftn(out_ft, s=(dim1, dim2, dim3), axes=(-3, -2, -1), norm="forward")

    # ---------------- pointwise_op_3D branch ----------------
    xw = conv1x1_3d(x, conv_w, conv_b)                 # (B, Cout, D1, D2, D3)
    ft = jnp.fft.rfftn(xw, axes=(-3, -2, -1))          # default (backward) norm, as torch
    F1, F2, F3 = ft.shape[-3], ft.shape[-2], ft.shape[-1]
    d1h, d2h, d3h = dim1 // 2, dim2 // 2, dim3 // 2
    i1 = jnp.arange(F1)
    i2 = jnp.arange(F2)
    i3 = jnp.arange(F3)
    m_1 = (i1 < d1h) | (i1 >= F1 - d1h)
    m_2 = (i2 < d2h) | (i2 >= F2 - d2h)
    m_3 = i3 < d3h
    mask = m_1[:, None, None] & m_2[None, :, None] & m_3[None, None, :]
    ft_u = ft * mask[None, None]                       # union of the four corner copies
    x2 = jnp.fft.irfftn(ft_u, s=(dim1, dim2, dim3), axes=(-3, -2, -1))
    # TODO(synk): torch then trilinearly interpolates x2 to (dim1, dim2, dim3); with
    # output grid == input grid (as here) that interpolation is the identity and the
    # mask-union equals the four corner copies.  General resizing is not implemented.

    # ---------------- fused add + GELU (Pallas) ----------------
    return add_gelu(x1.astype(jnp.float32), x2.astype(jnp.float32))


# ----------------------------------- main -----------------------------------

if __name__ == "__main__":
    key = jax.random.PRNGKey(0)
    k_x, k_p = jax.random.split(key)

    B, Cin, Cout = 2, 4, 4
    D1 = D2 = D3 = 8          # input grid == output grid (dim1, dim2, dim3)
    m1 = m2 = m3 = 3          # Fourier modes

    x = jax.random.normal(k_x, (B, Cin, D1, D2, D3), jnp.float32)
    w_spec, conv_w, conv_b = init_params(k_p, Cin, Cout, m1, m2, m3)

    # Hoisted weight re-layout: done once, outside the jitted forward.
    w_pack = jax.block_until_ready(pack_spectral_weights(w_spec))

    fwd = jax.jit(operator_block_3d, static_argnums=(4, 5, 6, 7, 8, 9))
    y = fwd(x, w_pack, conv_w, conv_b, D1, D2, D3, m1, m2, m3)
    jax.block_until_ready(y)
    assert y.shape == (B, Cout, D1, D2, D3)
    assert bool(jnp.all(jnp.isfinite(y)))
    print("KERNEL_OK")
</pallas_src>

<mosaic_0001>
module attributes {stable_mosaic.version = 11 : i64} {
  func.func @_conv1x1_kernel(%arg0: i32, %arg1: memref<4x1024xf32, #tpu.memory_space<vmem>>, %arg2: memref<4x4xf32, #tpu.memory_space<vmem>>, %arg3: memref<4x1xf32, #tpu.memory_space<vmem>>, %arg4: memref<4x1024xf32, #tpu.memory_space<vmem>>) attributes {dimension_semantics = [#tpu.dimension_semantics<parallel>], iteration_bounds = array<i64: 1>, scalar_prefetch = 0 : i64, scratch_operands = 0 : i64, tpu.core_type = #tpu.core_type<tc>, window_params = [{transform_indices = @transform_0, window_bounds = array<i64: 4, 1024>}, {pipeline_mode = #tpu.pipeline_mode<synchronous>, transform_indices = @transform_1, window_bounds = array<i64: 4, 4>}, {pipeline_mode = #tpu.pipeline_mode<synchronous>, transform_indices = @transform_2, window_bounds = array<i64: 4, 1>}, {transform_indices = @transform_3, window_bounds = array<i64: 4, 1024>}]} {
    %c0 = arith.constant 0 : index
    %c0_0 = arith.constant 0 : index
    %0 = vector.load %arg2[%c0, %c0_0] : memref<4x4xf32, #tpu.memory_space<vmem>>, vector<4x4xf32>
    %c0_1 = arith.constant 0 : index
    %c0_2 = arith.constant 0 : index
    %1 = vector.load %arg1[%c0_1, %c0_2] : memref<4x1024xf32, #tpu.memory_space<vmem>>, vector<4x1024xf32>
    %cst = arith.constant dense<0.000000e+00> : vector<4x1024xf32>
    %2 = tpu.matmul %0, %1, %cst {dimension_numbers = #tpu.dot_dimension_numbers<[1], [0], [0], [1], [0, 0, 1, 1], [], []>} : vector<4x4xf32>, vector<4x1024xf32>, vector<4x1024xf32> -> vector<4x1024xf32>
    %c0_3 = arith.constant 0 : index
    %c0_4 = arith.constant 0 : index
    %3 = vector.load %arg3[%c0_3, %c0_4] : memref<4x1xf32, #tpu.memory_space<vmem>>, vector<4x1xf32>
    %4 = vector.broadcast %3 : vector<4x1xf32> to vector<4x1024xf32>
    %5 = arith.addf %2, %4 : vector<4x1024xf32>
    %c0_5 = arith.constant 0 : index
    %c0_6 = arith.constant 0 : index
    %6 = vector.load %arg4[%c0_5, %c0_6] : memref<4x1024xf32, #tpu.memory_space<vmem>>, vector<4x1024xf32>
    tpu.vector_store %arg4[%c0_5, %c0_6], %5 {strides = array<i32>} : memref<4x1024xf32, #tpu.memory_space<vmem>>, vector<4x1024xf32>,
    return
  }
  func.func @transform_0(%arg0: i32) -> (i32, i32) {
    %c0_i32 = arith.constant 0 : i32
    %c0_i32_0 = arith.constant 0 : i32
    return %c0_i32, %arg0 : i32, i32
  }
  func.func @transform_1(%arg0: i32) -> (i32, i32) {
    %c0_i32 = arith.constant 0 : i32
    %c0_i32_0 = arith.constant 0 : i32
    %c0_i32_1 = arith.constant 0 : i32
    return %c0_i32, %c0_i32_0 : i32, i32
  }
  func.func @transform_2(%arg0: i32) -> (i32, i32) {
    %c0_i32 = arith.constant 0 : i32
    %c0_i32_0 = arith.constant 0 : i32
    %c0_i32_1 = arith.constant 0 : i32
    return %c0_i32, %c0_i32_0 : i32, i32
  }
  func.func @transform_3(%arg0: i32) -> (i32, i32) {
    %c0_i32 = arith.constant 0 : i32
    %c0_i32_0 = arith.constant 0 : i32
    return %c0_i32, %arg0 : i32, i32
  }
}

module attributes {stable_mosaic.version = 11 : i64} {
  func.func @_spec_mul_kernel(%arg0: i32, %arg1: i32, %arg2: memref<1x8x128xf32, #tpu.memory_space<vmem>>, %arg3: memref<32x128xf32, #tpu.memory_space<vmem>>, %arg4: memref<1x8x128xf32, #tpu.memory_space<vmem>>) attributes {dimension_semantics = [#tpu.dimension_semantics<parallel>, #tpu.dimension_semantics<arbitrary>], iteration_bounds = array<i64: 1, 2>, scalar_prefetch = 0 : i64, scratch_operands = 0 : i64, tpu.core_type = #tpu.core_type<tc>, window_params = [{transform_indices = @transform_0, window_bounds = array<i64: 1, 8, 128>}, {transform_indices = @transform_1, window_bounds = array<i64: 32, 128>}, {transform_indices = @transform_2, window_bounds = array<i64: 1, 8, 128>}]} {
    %cst = arith.constant 0.000000e+00 : f32
    %0 = vector.broadcast %cst : f32 to vector<4x128xf32>
    %cst_0 = arith.constant 0.000000e+00 : f32
    %1 = vector.broadcast %cst_0 : f32 to vector<4x128xf32>
    %c0 = arith.constant 0 : index
    %c0_1 = arith.constant 0 : index
    %c0_2 = arith.constant 0 : index
    %2 = vector.load %arg2[%c0, %c0_1, %c0_2] : memref<1x8x128xf32, #tpu.memory_space<vmem>>, vector<1x1x128xf32>
    %3 = vector.shape_cast %2 : vector<1x1x128xf32> to vector<1x128xf32>
    %c0_3 = arith.constant 0 : index
    %c4 = arith.constant 4 : index
    %c0_4 = arith.constant 0 : index
    %4 = vector.load %arg2[%c0_3, %c4, %c0_4] : memref<1x8x128xf32, #tpu.memory_space<vmem>>, vector<1x1x128xf32>
    %5 = vector.shape_cast %4 : vector<1x1x128xf32> to vector<1x128xf32>
    %c0_5 = arith.constant 0 : index
    %c0_6 = arith.constant 0 : index
    %6 = vector.load %arg3[%c0_5, %c0_6] : memref<32x128xf32, #tpu.memory_space<vmem>>, vector<4x128xf32>
    %c16 = arith.constant 16 : index
    %c0_7 = arith.constant 0 : index
    %7 = vector.load %arg3[%c16, %c0_7] : memref<32x128xf32, #tpu.memory_space<vmem>>, vector<4x128xf32>
    %8 = vector.shape_cast %3 : vector<1x128xf32> to vector<1x128xf32>
    %9 = vector.broadcast %8 : vector<1x128xf32> to vector<4x128xf32>
    %10 = vector.shape_cast %5 : vector<1x128xf32> to vector<1x128xf32>
    %11 = vector.broadcast %10 : vector<1x128xf32> to vector<4x128xf32>
    %12 = arith.mulf %9, %6 : vector<4x128xf32>
    %13 = arith.mulf %11, %7 : vector<4x128xf32>
    %14 = arith.subf %12, %13 : vector<4x128xf32>
    %15 = arith.addf %0, %14 : vector<4x128xf32>
    %16 = arith.mulf %9, %7 : vector<4x128xf32>
    %17 = arith.mulf %11, %6 : vector<4x128xf32>
    %18 = arith.addf %16, %17 : vector<4x128xf32>
    %19 = arith.addf %1, %18 : vector<4x128xf32>
    %c0_8 = arith.constant 0 : index
    %c1 = arith.constant 1 : index
    %c0_9 = arith.constant 0 : index
    %20 = vector.load %arg2[%c0_8, %c1, %c0_9] : memref<1x8x128xf32, #tpu.memory_space<vmem>>, vector<1x1x128xf32>
    %21 = vector.shape_cast %20 : vector<1x1x128xf32> to vector<1x128xf32>
    %c0_10 = arith.constant 0 : index
    %c5 = arith.constant 5 : index
    %c0_11 = arith.constant 0 : index
    %22 = vector.load %arg2[%c0_10, %c5, %c0_11] : memref<1x8x128xf32, #tpu.memory_space<vmem>>, vector<1x1x128xf32>
    %23 = vector.shape_cast %22 : vector<1x1x128xf32> to vector<1x128xf32>
    %c4_12 = arith.constant 4 : index
    %c0_13 = arith.constant 0 : index
    %24 = vector.load %arg3[%c4_12, %c0_13] : memref<32x128xf32, #tpu.memory_space<vmem>>, vector<4x128xf32>
    %c20 = arith.constant 20 : index
    %c0_14 = arith.constant 0 : index
    %25 = vector.load %arg3[%c20, %c0_14] : memref<32x128xf32, #tpu.memory_space<vmem>>, vector<4x128xf32>
    %26 = vector.shape_cast %21 : vector<1x128xf32> to vector<1x128xf32>
    %27 = vector.broadcast %26 : vector<1x128xf32> to vector<4x128xf32>
    %28 = vector.shape_cast %23 : vector<1x128xf32> to vector<1x128xf32>
    %29 = vector.broadcast %28 : vector<1x128xf32> to vector<4x128xf32>
    %30 = arith.mulf %27, %24 : vector<4x128xf32>
    %31 = arith.mulf %29, %25 : vector<4x128xf32>
    %32 = arith.subf %30, %31 : vector<4x128xf32>
    %33 = arith.addf %15, %32 : vector<4x128xf32>
    %34 = arith.mulf %27, %25 : vector<4x128xf32>
    %35 = arith.mulf %29, %24 : vector<4x128xf32>
    %36 = arith.addf %34, %35 : vector<4x128xf32>
    %37 = arith.addf %19, %36 : vector<4x128xf32>
    %c0_15 = arith.constant 0 : index
    %c2 = arith.constant 2 : index
    %c0_16 = arith.constant 0 : index
    %38 = vector.load %arg2[%c0_15, %c2, %c0_16] : memref<1x8x128xf32, #tpu.memory_space<vmem>>, vector<1x1x128xf32>
    %39 = vector.shape_cast %38 : vector<1x1x128xf32> to vector<1x128xf32>
    %c0_17 = arith.constant 0 : index
    %c6 = arith.constant 6 : index
    %c0_18 = arith.constant 0 : index
    %40 = vector.load %arg2[%c0_17, %c6, %c0_18] : memref<1x8x128xf32, #tpu.memory_space<vmem>>, vector<1x1x128xf32>
    %41 = vector.shape_cast %40 : vector<1x1x128xf32> to vector<1x128xf32>
    %c8 = arith.constant 8 : index
    %c0_19 = arith.constant 0 : index
    %42 = vector.load %arg3[%c8, %c0_19] : memref<32x128xf32, #tpu.memory_space<vmem>>, vector<4x128xf32>
    %c24 = arith.constant 24 : index
    %c0_20 = arith.constant 0 : index
    %43 = vector.load %arg3[%c24, %c0_20] : memref<32x128xf32, #tpu.memory_space<vmem>>, vector<4x128xf32>
    %44 = vector.shape_cast %39 : vector<1x128xf32> to vector<1x128xf32>
    %45 = vector.broadcast %44 : vector<1x128xf32> to vector<4x128xf32>
    %46 = vector.shape_cast %41 : vector<1x128xf32> to vector<1x128xf32>
    %47 = vector.broadcast %46 : vector<1x128xf32> to vector<4x128xf32>
    %48 = arith.mulf %45, %42 : vector<4x128xf32>
    %49 = arith.mulf %47, %43 : vector<4x128xf32>
    %50 = arith.subf %48, %49 : vector<4x128xf32>
    %51 = arith.addf %33, %50 : vector<4x128xf32>
    %52 = arith.mulf %45, %43 : vector<4x128xf32>
    %53 = arith.mulf %47, %42 : vector<4x128xf32>
    %54 = arith.addf %52, %53 : vector<4x128xf32>
    %55 = arith.addf %37, %54 : vector<4x128xf32>
    %c0_21 = arith.constant 0 : index
    %c3 = arith.constant 3 : index
    %c0_22 = arith.constant 0 : index
    %56 = vector.load %arg2[%c0_21, %c3, %c0_22] : memref<1x8x128xf32, #tpu.memory_space<vmem>>, vector<1x1x128xf32>
    %57 = vector.shape_cast %56 : vector<1x1x128xf32> to vector<1x128xf32>
    %c0_23 = arith.constant 0 : index
    %c7 = arith.constant 7 : index
    %c0_24 = arith.constant 0 : index
    %58 = vector.load %arg2[%c0_23, %c7, %c0_24] : memref<1x8x128xf32, #tpu.memory_space<vmem>>, vector<1x1x128xf32>
    %59 = vector.shape_cast %58 : vector<1x1x128xf32> to vector<1x128xf32>
    %c12 = arith.constant 12 : index
    %c0_25 = arith.constant 0 : index
    %60 = vector.load %arg3[%c12, %c0_25] : memref<32x128xf32, #tpu.memory_space<vmem>>, vector<4x128xf32>
    %c28 = arith.constant 28 : index
    %c0_26 = arith.constant 0 : index
    %61 = vector.load %arg3[%c28, %c0_26] : memref<32x128xf32, #tpu.memory_space<vmem>>, vector<4x128xf32>
    %62 = vector.shape_cast %57 : vector<1x128xf32> to vector<1x128xf32>
    %63 = vector.broadcast %62 : vector<1x128xf32> to vector<4x128xf32>
    %64 = vector.shape_cast %59 : vector<1x128xf32> to vector<1x128xf32>
    %65 = vector.broadcast %64 : vector<1x128xf32> to vector<4x128xf32>
    %66 = arith.mulf %63, %60 : vector<4x128xf32>
    %67 = arith.mulf %65, %61 : vector<4x128xf32>
    %68 = arith.subf %66, %67 : vector<4x128xf32>
    %69 = arith.addf %51, %68 : vector<4x128xf32>
    %70 = arith.mulf %63, %61 : vector<4x128xf32>
    %71 = arith.mulf %65, %60 : vector<4x128xf32>
    %72 = arith.addf %70, %71 : vector<4x128xf32>
    %73 = arith.addf %55, %72 : vector<4x128xf32>
    %c0_27 = arith.constant 0 : index
    %c0_28 = arith.constant 0 : index
    %c0_29 = arith.constant 0 : index
    %74 = vector.load %arg4[%c0_27, %c0_28, %c0_29] : memref<1x8x128xf32, #tpu.memory_space<vmem>>, vector<1x4x128xf32>
    %75 = vector.shape_cast %74 : vector<1x4x128xf32> to vector<4x128xf32>
    %76 = vector.shape_cast %69 : vector<4x128xf32> to vector<1x4x128xf32>
    tpu.vector_store %arg4[%c0_27, %c0_28, %c0_29], %76 {strides = array<i32>} : memref<1x8x128xf32, #tpu.memory_space<vmem>>, vector<1x4x128xf32>,
    %c0_30 = arith.constant 0 : index
    %c4_31 = arith.constant 4 : index
    %c0_32 = arith.constant 0 : index
    %77 = vector.load %arg4[%c0_30, %c4_31, %c0_32] : memref<1x8x128xf32, #tpu.memory_space<vmem>>, vector<1x4x128xf32>
    %78 = vector.shape_cast %77 : vector<1x4x128xf32> to vector<4x128xf32>
    %79 = vector.shape_cast %73 : vector<4x128xf32> to vector<1x4x128xf32>
    tpu.vector_store %arg4[%c0_30, %c4_31, %c0_32], %79 {strides = array<i32>} : memref<1x8x128xf32, #tpu.memory_space<vmem>>, vector<1x4x128xf32>,
    return
  }
  func.func @transform_0(%arg0: i32, %arg1: i32) -> (i32, i32, i32) {
    %c0_i32 = arith.constant 0 : i32
    %c0_i32_0 = arith.constant 0 : i32
    return %arg1, %c0_i32, %arg0 : i32, i32, i32
  }
  func.func @transform_1(%arg0: i32, %arg1: i32) -> (i32, i32) {
    %c0_i32 = arith.constant 0 : i32
    %c0_i32_0 = arith.constant 0 : i32
    return %c0_i32, %arg0 : i32, i32
  }
  func.func @transform_2(%arg0: i32, %arg1: i32) -> (i32, i32, i32) {
    %c0_i32 = arith.constant 0 : i32
    %c0_i32_0 = arith.constant 0 : i32
    return %arg1, %c0_i32, %arg0 : i32, i32, i32
  }
}

module attributes {stable_mosaic.version = 11 : i64} {
  func.func @_add_gelu_kernel(%arg0: i32, %arg1: i32, %arg2: memref<8x512xf32, #tpu.memory_space<vmem>>, %arg3: memref<8x512xf32, #tpu.memory_space<vmem>>, %arg4: memref<8x512xf32, #tpu.memory_space<vmem>>) attributes {dimension_semantics = [#tpu.dimension_semantics<parallel>, #tpu.dimension_semantics<parallel>], iteration_bounds = array<i64: 1, 1>, scalar_prefetch = 0 : i64, scratch_operands = 0 : i64, tpu.core_type = #tpu.core_type<tc>, window_params = [{transform_indices = @transform_0, window_bounds = array<i64: 8, 512>}, {transform_indices = @transform_1, window_bounds = array<i64: 8, 512>}, {transform_indices = @transform_2, window_bounds = array<i64: 8, 512>}]} {
    %c0 = arith.constant 0 : index
    %c0_0 = arith.constant 0 : index
    %0 = vector.load %arg2[%c0, %c0_0] : memref<8x512xf32, #tpu.memory_space<vmem>>, vector<8x512xf32>
    %c0_1 = arith.constant 0 : index
    %c0_2 = arith.constant 0 : index
    %1 = vector.load %arg3[%c0_1, %c0_2] : memref<8x512xf32, #tpu.memory_space<vmem>>, vector<8x512xf32>
    %2 = arith.addf %0, %1 : vector<8x512xf32>
    %cst = arith.constant 0.707106769 : f32
    %3 = vector.broadcast %cst : f32 to vector<8x512xf32>
    %4 = arith.mulf %2, %3 : vector<8x512xf32>
    %5 = math.absf %4 : vector<8x512xf32>
    %cst_3 = arith.constant 0.327591091 : f32
    %6 = vector.broadcast %cst_3 : f32 to vector<8x512xf32>
    %7 = arith.mulf %6, %5 : vector<8x512xf32>
    %cst_4 = arith.constant 1.000000e+00 : f32
    %8 = vector.broadcast %cst_4 : f32 to vector<8x512xf32>
    %9 = arith.addf %8, %7 : vector<8x512xf32>
    %cst_5 = arith.constant 1.000000e+00 : f32
    %10 = vector.broadcast %cst_5 : f32 to vector<8x512xf32>
    %11 = arith.divf %10, %9 : vector<8x512xf32>
    %cst_6 = arith.constant 1.06140542 : f32
    %12 = vector.broadcast %cst_6 : f32 to vector<8x512xf32>
    %13 = arith.mulf %11, %12 : vector<8x512xf32>
    %cst_7 = arith.constant -1.45315206 : f32
    %14 = vector.broadcast %cst_7 : f32 to vector<8x512xf32>
    %15 = arith.addf %14, %13 : vector<8x512xf32>
    %16 = arith.mulf %11, %15 : vector<8x512xf32>
    %cst_8 = arith.constant 1.42141378 : f32
    %17 = vector.broadcast %cst_8 : f32 to vector<8x512xf32>
    %18 = arith.addf %17, %16 : vector<8x512xf32>
    %19 = arith.mulf %11, %18 : vector<8x512xf32>
    %cst_9 = arith.constant -0.284496725 : f32
    %20 = vector.broadcast %cst_9 : f32 to vector<8x512xf32>
    %21 = arith.addf %20, %19 : vector<8x512xf32>
    %22 = arith.mulf %11, %21 : vector<8x512xf32>
    %cst_10 = arith.constant 0.254829586 : f32
    %23 = vector.broadcast %cst_10 : f32 to vector<8x512xf32>
    %24 = arith.addf %23, %22 : vector<8x512xf32>
    %25 = arith.mulf %11, %24 : vector<8x512xf32>
    %cst_11 = arith.constant 0.000000e+00 : f32
    %26 = vector.broadcast %cst_11 : f32 to vector<8x512xf32>
    %27 = arith.subf %26, %5 : vector<8x512xf32>
    %28 = arith.mulf %27, %5 : vector<8x512xf32>
    %29 = math.exp %28 : vector<8x512xf32>
    %30 = arith.mulf %25, %29 : vector<8x512xf32>
    %cst_12 = arith.constant 1.000000e+00 : f32
    %31 = vector.broadcast %cst_12 : f32 to vector<8x512xf32>
    %32 = arith.subf %31, %30 : vector<8x512xf32>
    %cst_13 = arith.constant 0.000000e+00 : f32
    %33 = vector.broadcast %cst_13 : f32 to vector<8x512xf32>
    %34 = arith.cmpf oge, %4, %33 : vector<8x512xf32>
    %cst_14 = arith.constant 0.000000e+00 : f32
    %35 = vector.broadcast %cst_14 : f32 to vector<8x512xf32>
    %36 = arith.subf %35, %32 : vector<8x512xf32>
    %37 = arith.select %34, %32, %36 : vector<8x512xi1>, vector<8x512xf32>
    %cst_15 = arith.constant 5.000000e-01 : f32
    %38 = vector.broadcast %cst_15 : f32 to vector<8x512xf32>
    %39 = arith.mulf %38, %2 : vector<8x512xf32>
    %cst_16 = arith.constant 1.000000e+00 : f32
    %40 = vector.broadcast %cst_16 : f32 to vector<8x512xf32>
    %41 = arith.addf %40, %37 : vector<8x512xf32>
    %42 = arith.mulf %39, %41 : vector<8x512xf32>
    %c0_17 = arith.constant 0 : index
    %c0_18 = arith.constant 0 : index
    %43 = vector.load %arg4[%c0_17, %c0_18] : memref<8x512xf32, #tpu.memory_space<vmem>>, vector<8x512xf32>
    tpu.vector_store %arg4[%c0_17, %c0_18], %42 {strides = array<i32>} : memref<8x512xf32, #tpu.memory_space<vmem>>, vector<8x512xf32>,
    return
  }
  func.func @transform_0(%arg0: i32, %arg1: i32) -> (i32, i32) {
    %c0_i32 = arith.constant 0 : i32
    return %arg0, %arg1 : i32, i32
  }
  func.func @transform_1(%arg0: i32, %arg1: i32) -> (i32, i32) {
    %c0_i32 = arith.constant 0 : i32
    return %arg0, %arg1 : i32, i32
  }
  func.func @transform_2(%arg0: i32, %arg1: i32) -> (i32, i32) {
    %c0_i32 = arith.constant 0 : i32
    return %arg0, %arg1 : i32, i32
  }
}

</mosaic_0001>

<bundles_post_ra>
// kernel: operator_block_3d.4
= control target key start
LH: loop header
LB: loop body
LE: loop exit
PB: predicated region body
PF: predicated region fallthrough
CT: control target
= control target key end

     0   :  { %vm37_vm0 = vcmask 1043456   ;;  %v381_v2 = vmov 0.0   ;;  %v382_v7 = vmov 0   ;;  %vm33_vm1 = vcmask 31744   ;;  %s445_s0 = inlined_call_operand.vmem [shape: f32[4,1024], index: 0, kind: input, shape index: {}]   ;;  %s446_s1 = inlined_call_operand.vmem [shape: f32[4,4], index: 1, kind: input, shape index: {}]   ;;  %s447_s2 = inlined_call_operand.vmem [shape: f32[4,1], index: 2, kind: input, shape index: {}]   ;;  %s448_s3 = inlined_call_operand.vmem [shape: f32[4,1024], index: 3, kind: output, shape index: {}]  }
   0x1   :  { %v15_v0 = vld [vmem:[%s445_s0] sm:$0xff]  ;;  %v16_v1 = vld [vmem:[%s445_s0 + $0x8] sm:$0xff]  ;;  %118 = vmatprep.mubr.f32.mxu0 %v381_v2  ;;  %189 = vmatprep.mubr.f32.mxu1 %v381_v2  ;;  %v17_v5 = vld [vmem:[%s445_s0 + $0x10] sm:$0xff] }
   0x2   :  { %v29_v3 = vcombine.high %v15_v0, %v15_v0  ;;  %v30_v4 = vcombine.high %v16_v1, %v16_v1  ;;  %v18_v6 = vld [vmem:[%s445_s0 + $0x18] sm:$0xff]  ;;  %376 = vset.pattern.permute.xlu0 %v382_v7  ;;  %v19_v8 = vld [vmem:[%s447_s2] sm:$0xf]  ;;  %v31_v10 = vcombine.high %v17_v5, %v17_v5 }
   0x3   :  { %v14_v9 = vld [vmem:[%s446_s1] sm:$0xf]  ;;  %v32_v11 = vcombine.high %v18_v6, %v18_v6  ;;  %22 = vperm.xlu0 %376, %v19_v8  }
   0x4   :  { %362 = vmatprep.subr.msk.mxu0 %vm37_vm0, %v29_v3  ;;  %365 = vmatprep.subr.msk.mxu1 %vm37_vm0, %v30_v4 }
   0x5   :  { %363 = vmatpush1.msk.msra.mxu0 %vm37_vm0, %v15_v0  ;;  %366 = vmatpush1.msk.msra.mxu1 %vm37_vm0, %v16_v1 }
   0x6   :  { %364 = vmatmul.mubr.msk.f32.vlgmr.msra.gmra.mxu0 %vm33_vm1, %v14_v9  ;;  %367 = vmatmul.mubr.msk.f32.vlgmr.msra.gmra.mxu1 %vm33_vm1, %v14_v9 }
   0x7   :  { %368 = vmatprep.subr.msk.mxu0 %vm37_vm0, %v31_v10  ;;  %371 = vmatprep.subr.msk.mxu1 %vm37_vm0, %v32_v11 }
   0x8   :  { %369 = vmatpush1.msk.msra.mxu0 %vm37_vm0, %v17_v5  ;;  %372 = vmatpush1.msk.msra.mxu1 %vm37_vm0, %v18_v6 }
   0x9   :  { %260 = vmatprep.mubr.f32.mxu0 %v381_v2  ;;  %331 = vmatprep.mubr.f32.mxu1 %v381_v2 }
   0xa   :  { %370 = vmatmul.mubr.msk.f32.vlgmr.msra.gmra.mxu0 %vm33_vm1, %v14_v9  ;;  %373 = vmatmul.mubr.msk.f32.vlgmr.msra.gmra.mxu1 %vm33_vm1, %v14_v9 }
  0x7e   :  { %v23_v12 = vpop.permute.xlu0 %22 }
  0xc6   :  { %v120_v13 = vpop.f32.mrf.mxu0  ;;  %v191_v14 = vpop.f32.mrf.mxu1 }
  0xc7   :  { %v121_v17 = vadd.f32 %v120_v13, %v23_v12  ;;  %v192_v19 = vadd.f32 %v191_v14, %v23_v12 }
  0xc8   :  { %v122_v15 = vpop.f32.mrf.mxu0  ;;  %v193_v16 = vpop.f32.mrf.mxu1 }
  0xc9   :  { %v123_v18 = vadd.f32 %v122_v15, %v23_v12  ;;  %v194_v20 = vadd.f32 %v193_v16, %v23_v12 }
  0xca   :  { %v262_v21 = vpop.f32.mrf.mxu0  ;;  %v333_v22 = vpop.f32.mrf.mxu1 }
  0xcb   :  { %v346_v23 = vcombine.low %v121_v17, %v123_v18  ;;  %v347_v24 = vcombine.low %v192_v19, %v194_v20  ;;  %v263_v27 = vadd.f32 %v262_v21, %v23_v12  ;;  %v334_v28 = vadd.f32 %v333_v22, %v23_v12 }
  0xcc   :  { %v264_v25 = vpop.f32.mrf.mxu0  ;;  %v335_v26 = vpop.f32.mrf.mxu1 }
  0xcd   :  { %354 = vst [vmem:[%s448_s3] sm:$0xff] %v346_v23  ;;  %355 = vst [vmem:[%s448_s3 + $0x8] sm:$0xff] %v347_v24  ;;  %v265_v29 = vadd.f32 %v264_v25, %v23_v12  ;;  %v336_v30 = vadd.f32 %v335_v26, %v23_v12 }
  0xcf   :  { %v348_v31 = vcombine.low %v263_v27, %v265_v29  ;;  %v349_v32 = vcombine.low %v334_v28, %v336_v30 }
  0xd1   :  { %356 = vst [vmem:[%s448_s3 + $0x10] sm:$0xff] %v348_v31  ;;  %357 = vst [vmem:[%s448_s3 + $0x18] sm:$0xff] %v349_v32 }

// kernel: reverse.6
= control target key start
LH: loop header
LB: loop body
LE: loop exit
PB: predicated region body
PF: predicated region fallthrough
CT: control target
= control target key end

     0   :  { %s296_s0 = inlined_call_operand.vmem [shape: f32[2,4,8,8,3], index: 0, kind: input, shape index: {}]   ;;  %s297_s1 = inlined_call_operand.vmem [shape: f32[2,4,8,8,3], index: 1, kind: output, shape index: {}]  }
   0x1   :  { %v96_v0 = vld [vmem:[%s296_s0 + $0x10] sm:$0xff]  ;;  %v99_v2 = vld [vmem:[%s296_s0 + $0x28] sm:$0xff]  ;;  %v103_v4 = vld [vmem:[%s296_s0 + $0x40] sm:$0xff] }
   0x2   :  { %v97_v1 = vld [vmem:[%s296_s0 + $0x70] sm:$0xff]  ;;  %4 = vst [vmem:[%s297_s1] sm:$0xff] %v96_v0  ;;  %100 = vst [vmem:[%s297_s1 + $0x18] sm:$0xff] %v99_v2  ;;  %v101_v3 = vld [vmem:[%s296_s0 + $0x88] sm:$0xff] }
   0x3   :  { %98 = vst [vmem:[%s297_s1 + $0x60] sm:$0xff] %v97_v1  ;;  %v105_v5 = vld [vmem:[%s296_s0 + $0xa0] sm:$0xff]  ;;  %102 = vst [vmem:[%s297_s1 + $0x78] sm:$0xff] %v101_v3  ;;  %v107_v6 = vld [vmem:[%s296_s0 + $0x58] sm:$0xff] }
   0x4   :  { %104 = vst [vmem:[%s297_s1 + $0x30] sm:$0xff] %v103_v4  ;;  %106 = vst [vmem:[%s297_s1 + $0x90] sm:$0xff] %v105_v5  ;;  %v109_v7 = vld [vmem:[%s296_s0 + $0xb8] sm:$0xff]  ;;  %v111_v8 = vld [vmem:[%s296_s0 + $0x8] sm:$0xff] }
   0x5   :  { %108 = vst [vmem:[%s297_s1 + $0x48] sm:$0xff] %v107_v6  ;;  %110 = vst [vmem:[%s297_s1 + $0xa8] sm:$0xff] %v109_v7  ;;  %v113_v9 = vld [vmem:[%s296_s0 + $0x68] sm:$0xff]  ;;  %v115_v10 = vld [vmem:[%s296_s0 + $0x20] sm:$0xff] }
   0x6   :  { %112 = vst [vmem:[%s297_s1 + $0x8] sm:$0xff] %v111_v8  ;;  %v117_v11 = vld [vmem:[%s296_s0 + $0x80] sm:$0xff]  ;;  %114 = vst [vmem:[%s297_s1 + $0x68] sm:$0xff] %v113_v9  ;;  %v119_v12 = vld [vmem:[%s296_s0 + $0x38] sm:$0xff] }
   0x7   :  { %116 = vst [vmem:[%s297_s1 + $0x20] sm:$0xff] %v115_v10  ;;  %118 = vst [vmem:[%s297_s1 + $0x80] sm:$0xff] %v117_v11  ;;  %v121_v13 = vld [vmem:[%s296_s0 + $0x98] sm:$0xff]  ;;  %v123_v14 = vld [vmem:[%s296_s0 + $0x50] sm:$0xff] }
   0x8   :  { %120 = vst [vmem:[%s297_s1 + $0x38] sm:$0xff] %v119_v12  ;;  %122 = vst [vmem:[%s297_s1 + $0x98] sm:$0xff] %v121_v13  ;;  %v125_v15 = vld [vmem:[%s296_s0 + $0xb0] sm:$0xff]  ;;  %v65_v16 = vld [vmem:[%s296_s0] sm:$0xff] }
   0x9   :  { %124 = vst [vmem:[%s297_s1 + $0x50] sm:$0xff] %v123_v14  ;;  %v128_v17 = vld [vmem:[%s296_s0 + $0x60] sm:$0xff]  ;;  %126 = vst [vmem:[%s297_s1 + $0xb0] sm:$0xff] %v125_v15  ;;  %v130_v18 = vld [vmem:[%s296_s0 + $0x18] sm:$0xff] }
   0xa   :  { %127 = vst [vmem:[%s297_s1 + $0x10] sm:$0xff] %v65_v16  ;;  %129 = vst [vmem:[%s297_s1 + $0x70] sm:$0xff] %v128_v17  ;;  %v132_v19 = vld [vmem:[%s296_s0 + $0x78] sm:$0xff]  ;;  %v134_v20 = vld [vmem:[%s296_s0 + $0x30] sm:$0xff] }
   0xb   :  { %131 = vst [vmem:[%s297_s1 + $0x28] sm:$0xff] %v130_v18  ;;  %133 = vst [vmem:[%s297_s1 + $0x88] sm:$0xff] %v132_v19  ;;  %v136_v21 = vld [vmem:[%s296_s0 + $0x90] sm:$0xff]  ;;  %v138_v22 = vld [vmem:[%s296_s0 + $0x48] sm:$0xff] }
   0xc   :  { %135 = vst [vmem:[%s297_s1 + $0x40] sm:$0xff] %v134_v20  ;;  %v140_v23 = vld [vmem:[%s296_s0 + $0xa8] sm:$0xff]  ;;  %137 = vst [vmem:[%s297_s1 + $0xa0] sm:$0xff] %v136_v21 }
   0xd   :  { %139 = vst [vmem:[%s297_s1 + $0x58] sm:$0xff] %v138_v22  ;;  %141 = vst [vmem:[%s297_s1 + $0xb8] sm:$0xff] %v140_v23 }

// kernel: squeeze.4
= control target key start
LH: loop header
LB: loop body
LE: loop exit
PB: predicated region body
PF: predicated region fallthrough
CT: control target
= control target key end

     0   :  { %s338_s10 = smov 125   ;;  %vm12_vm0 = vcmask 23552   ;;  %s339_s11 = smov 116   ;;  %s467_s0 = inlined_call_operand.vmem [shape: f32[1,2,4,27], index: 0, kind: input, shape index: {}]   ;;  %s468_s1 = inlined_call_operand.vmem [shape: f32[2,4,3,3,3], index: 1, kind: output, shape index: {}]  }
   0x1   :  { %v305_v0 = vld [vmem:[%s467_s0 + $0x4] sm:$0xf]  ;;  %v9_v1 = vld [vmem:[%s467_s0] sm:$0xf]  ;;  %s337_s0 = smov 119   ;;  %s340_s12 = smov 122  }
   0x2   :  { %8 = vst [vmem:[#allocation1 + $0x8] sm:$0xf] %v305_v0  ;;  %10 = vst [vmem:[#allocation1] sm:$0xf] %v9_v1  ;;  %s341_s13 = smov 110   ;;  %s342_s14 = smov 113  }
   0x3   :  { %s343_s15 = smov 104   ;;  %s344_s16 = smov 107  }
   0x9   :  { %v43_v2 = vld.sshfl [vmem:[#allocation1] sm:$0xff pattern:$0xab892301]  }
   0xa   :  { %v19_v3 = vld.sshfl [vmem:[#allocation1] sm:$0xff pattern:$0x9ab81230]   ;;  %44 = vrot.lane.b32.xlu1 %v43_v2, %s337_s0 }
   0xb   :  { %20 = vrot.lane.b32.xlu0 %v19_v3, %s338_s10  ;;  %v15_v4 = vld [vmem:[#allocation1 + $0x8] sm:$0xf]   ;;  %v11_v5 = vld [vmem:[#allocation1] sm:$0xf]  }
   0xc   :  { %18 = vst.msk [vmem:[#allocation0 + $0x60] ss:$24 sm:$0xf] %vm12_vm0, %v15_v4   ;;  %13 = vst.msk [vmem:[#allocation0] ss:$24 sm:$0xf] %vm12_vm0, %v11_v5  }
   0xd   :  { %v79_v6 = vld.sshfl [vmem:[#allocation1] sm:$0xff pattern:$0xb89a3012]  }
   0xe   :  { %56 = vrot.lane.b32.xlu1 %v43_v2, %s339_s11 }
   0xf   :  { %32 = vrot.lane.b32.xlu0 %v19_v3, %s340_s12 }
  0x12   :  { %80 = vrot.lane.b32.xlu1 %v79_v6, %s341_s13 }
  0x13   :  { %68 = vrot.lane.b32.xlu0 %v43_v2, %s342_s14 }
  0x16   :  { %104 = vrot.lane.b32.xlu1 %v79_v6, %s343_s15 }
  0x17   :  { %92 = vrot.lane.b32.xlu0 %v79_v6, %s344_s16 }
  0x7c   :  { %v45_v7 = vpop.permute.xlu1 %44  }
  0x7d   :  { %v21_v8 = vpop.permute.xlu0 %20   ;;  %48 = vst.msk [vmem:[#allocation0 + $0x20] ss:$-24 sm:$0x3] %vm12_vm0, %v45_v7   ;;  %50 = vst.msk [vmem:[#allocation0 + $0x80] ss:$-24 sm:$0xc] %vm12_vm0, %v45_v7  }
  0x7e   :  { %52 = vst.msk [vmem:[#allocation0 + $0xe0] ss:$-24 sm:$0x30] %vm12_vm0, %v45_v7   ;;  %54 = vst.msk [vmem:[#allocation0 + $0x140] ss:$-24 sm:$0xc0] %vm12_vm0, %v45_v7  }
  0x7f   :  { %24 = vst.msk [vmem:[#allocation0 + $0x1] ss:$72 sm:$0x3] %vm12_vm0, %v21_v8   ;;  %26 = vst.msk [vmem:[#allocation0 + $0x61] ss:$-24 sm:$0xc] %vm12_vm0, %v21_v8  }
  0x80   :  { %28 = vst.msk [vmem:[#allocation0 - $0xbf] ss:$72 sm:$0x30] %vm12_vm0, %v21_v8   ;;  %30 = vst.msk [vmem:[#allocation0 + $0x121] ss:$-24 sm:$0xc0] %vm12_vm0, %v21_v8   ;;  %v57_v9 = vpop.permute.xlu1 %56  }
  0x81   :  { %v33_v10 = vpop.permute.xlu0 %32   ;;  %60 = vst.msk [vmem:[#allocation0 + $0x21] ss:$-24 sm:$0x3] %vm12_vm0, %v57_v9   ;;  %62 = vst.msk [vmem:[#allocation0 + $0x81] ss:$-24 sm:$0xc] %vm12_vm0, %v57_v9  }
  0x82   :  { %64 = vst.msk [vmem:[#allocation0 + $0xe1] ss:$-24 sm:$0x30] %vm12_vm0, %v57_v9   ;;  %66 = vst.msk [vmem:[#allocation0 + $0x141] ss:$-24 sm:$0xc0] %vm12_vm0, %v57_v9  }
  0x83   :  { %36 = vst.msk [vmem:[#allocation0 + $0x2] ss:$72 sm:$0x3] %vm12_vm0, %v33_v10   ;;  %38 = vst.msk [vmem:[#allocation0 + $0x62] ss:$-24 sm:$0xc] %vm12_vm0, %v33_v10  }
  0x84   :  { %40 = vst.msk [vmem:[#allocation0 - $0xbe] ss:$72 sm:$0x30] %vm12_vm0, %v33_v10   ;;  %42 = vst.msk [vmem:[#allocation0 + $0x122] ss:$-24 sm:$0xc0] %vm12_vm0, %v33_v10   ;;  %v81_v11 = vpop.permute.xlu1 %80  }
  0x85   :  { %v69_v12 = vpop.permute.xlu0 %68   ;;  %84 = vst.msk [vmem:[#allocation0 + $0x40] ss:$-24 sm:$0x7] %vm12_vm0, %v81_v11   ;;  %86 = vst.msk [vmem:[#allocation0 - $0x80] ss:$72 sm:$0x18] %vm12_vm0, %v81_v11  }
  0x86   :  { %88 = vst.msk [vmem:[#allocation0 + $0x100] ss:$-24 sm:$0x60] %vm12_vm0, %v81_v11   ;;  %90 = vst.msk [vmem:[#allocation0 + $0xb1] sm:$0x80] %vm12_vm0, %v81_v11  }
  0x87   :  { %72 = vst.msk [vmem:[#allocation0 + $0x22] ss:$-24 sm:$0x3] %vm12_vm0, %v69_v12   ;;  %74 = vst.msk [vmem:[#allocation0 + $0x82] ss:$-24 sm:$0xc] %vm12_vm0, %v69_v12  }
  0x88   :  { %76 = vst.msk [vmem:[#allocation0 + $0xe2] ss:$-24 sm:$0x30] %vm12_vm0, %v69_v12   ;;  %78 = vst.msk [vmem:[#allocation0 + $0x142] ss:$-24 sm:$0xc0] %vm12_vm0, %v69_v12   ;;  %v105_v16 = vpop.permute.xlu1 %104  }
  0x89   :  { %v93_v17 = vpop.permute.xlu0 %92   ;;  %108 = vst.msk [vmem:[#allocation0 + $0x42] ss:$-24 sm:$0x7] %vm12_vm0, %v105_v16   ;;  %110 = vst.msk [vmem:[#allocation0 - $0x7e] ss:$72 sm:$0x18] %vm12_vm0, %v105_v16  }
  0x8a   :  { %v119_v13 = vld [vmem:[#allocation0] sm:$0xf]  ;;  %v137_v14 = vld [vmem:[#allocation0 + $0x18] sm:$0xf]  ;;  %v158_v15 = vld [vmem:[#allocation0 + $0x30] sm:$0xf] }
  0x8b   :  { %122 = vst [vmem:[%s468_s1] sm:$0xf] %v119_v13  ;;  %308 = vst [vmem:[%s468_s1 + $0xc] sm:$0xf] %v137_v14  ;;  %v179_v18 = vld [vmem:[#allocation0 + $0x48] sm:$0xf] }
  0x8c   :  { %311 = vst [vmem:[%s468_s1 + $0x18] sm:$0xf] %v158_v15  ;;  %v200_v19 = vld [vmem:[#allocation0 + $0x60] sm:$0xf]  ;;  %v221_v20 = vld [vmem:[#allocation0 + $0x78] sm:$0xf] }
  0x8d   :  { %112 = vst.msk [vmem:[#allocation0 + $0x102] ss:$-24 sm:$0x60] %vm12_vm0, %v105_v16   ;;  %114 = vst.msk [vmem:[#allocation0 + $0xb3] sm:$0x80] %vm12_vm0, %v105_v16  }
  0x8e   :  { %96 = vst.msk [vmem:[#allocation0 + $0x41] ss:$-24 sm:$0x7] %vm12_vm0, %v93_v17   ;;  %98 = vst.msk [vmem:[#allocation0 - $0x7f] ss:$72 sm:$0x18] %vm12_vm0, %v93_v17  }
  0x8f   :  { %100 = vst.msk [vmem:[#allocation0 + $0x101] ss:$-24 sm:$0x60] %vm12_vm0, %v93_v17   ;;  %102 = vst.msk [vmem:[#allocation0 + $0xb2] sm:$0x80] %vm12_vm0, %v93_v17  }
  0x90   :  { %314 = vst [vmem:[%s468_s1 + $0x24] sm:$0xf] %v179_v18  ;;  %v242_v21 = vld [vmem:[#allocation0 + $0x90] sm:$0xf]  ;;  %v263_v22 = vld [vmem:[#allocation0 + $0xa8] sm:$0xf] }
  0x91   :  { %317 = vst [vmem:[%s468_s1 + $0x30] sm:$0xf] %v200_v19  ;;  %320 = vst [vmem:[%s468_s1 + $0x3c] sm:$0xf] %v221_v20  ;;  %v124_v23 = vld [vmem:[#allocation0 + $0x8] sm:$0xf] }
  0x92   :  { %323 = vst [vmem:[%s468_s1 + $0x48] sm:$0xf] %v242_v21  ;;  %326 = vst [vmem:[%s468_s1 + $0x54] sm:$0xf] %v263_v22  ;;  %v144_v24 = vld [vmem:[#allocation0 + $0x20] sm:$0xf] }
  0x93   :  { %v165_v25 = vld [vmem:[#allocation0 + $0x38] sm:$0xf]  ;;  %306 = vst [vmem:[%s468_s1 + $0x4] sm:$0xf] %v124_v23  ;;  %309 = vst [vmem:[%s468_s1 + $0x10] sm:$0xf] %v144_v24 }
  0x94   :  { %312 = vst [vmem:[%s468_s1 + $0x1c] sm:$0xf] %v165_v25  ;;  %v186_v26 = vld [vmem:[#allocation0 + $0x50] sm:$0xf]  ;;  %v207_v27 = vld [vmem:[#allocation0 + $0x68] sm:$0xf] }
  0x95   :  { %v228_v28 = vld [vmem:[#allocation0 + $0x80] sm:$0xf]  ;;  %315 = vst [vmem:[%s468_s1 + $0x28] sm:$0xf] %v186_v26  ;;  %v249_v29 = vld [vmem:[#allocation0 + $0x98] sm:$0xf] }
  0x96   :  { %v270_v30 = vld [vmem:[#allocation0 + $0xb0] sm:$0xf]  ;;  %318 = vst [vmem:[%s468_s1 + $0x34] sm:$0xf] %v207_v27  ;;  %321 = vst [vmem:[%s468_s1 + $0x40] sm:$0xf] %v228_v28 }
  0x97   :  { %324 = vst [vmem:[%s468_s1 + $0x4c] sm:$0xf] %v249_v29  ;;  %327 = vst [vmem:[%s468_s1 + $0x58] sm:$0xf] %v270_v30  ;;  %v130_v31 = vld [vmem:[#allocation0 + $0x10] sm:$0xf] }
  0x98   :  { %v151_v32 = vld [vmem:[#allocation0 + $0x28] sm:$0xf]  ;;  %v172_v33 = vld [vmem:[#allocation0 + $0x40] sm:$0xf]  ;;  %307 = vst [vmem:[%s468_s1 + $0x8] sm:$0xf] %v130_v31 }
  0x99   :  { %310 = vst [vmem:[%s468_s1 + $0x14] sm:$0xf] %v151_v32  ;;  %313 = vst [vmem:[%s468_s1 + $0x20] sm:$0xf] %v172_v33  ;;  %v193_v34 = vld [vmem:[#allocation0 + $0x58] sm:$0xf] }
  0x9a   :  { %v214_v35 = vld [vmem:[#allocation0 + $0x70] sm:$0xf]  ;;  %v235_v36 = vld [vmem:[#allocation0 + $0x88] sm:$0xf]  ;;  %316 = vst [vmem:[%s468_s1 + $0x2c] sm:$0xf] %v193_v34 }
  0x9b   :  { %319 = vst [vmem:[%s468_s1 + $0x38] sm:$0xf] %v214_v35  ;;  %322 = vst [vmem:[%s468_s1 + $0x44] sm:$0xf] %v235_v36  ;;  %v256_v37 = vld [vmem:[#allocation0 + $0xa0] sm:$0xf] }
  0x9c   :  { %v277_v38 = vld [vmem:[#allocation0 + $0xb8] sm:$0xf]  ;;  %325 = vst [vmem:[%s468_s1 + $0x50] sm:$0xf] %v256_v37 }
  0x9d   :  { %328 = vst [vmem:[%s468_s1 + $0x5c] sm:$0xf] %v277_v38 }

// kernel: operator_block_3d.3
= control target key start
LH: loop header
LB: loop body
LE: loop exit
PB: predicated region body
PF: predicated region fallthrough
CT: control target
= control target key end

     0   :  { %s440_s9 = smov 0   ;;  %s442_s10 = smov 0   ;;  %s504_s0 = inlined_call_operand.vmem [shape: f32[2,8,128], index: 0, kind: input, shape index: {}]   ;;  %s505_s1 = inlined_call_operand.vmem [shape: f32[32,128], index: 1, kind: input, shape index: {}]   ;;  %s506_s2 = inlined_call_operand.vmem [shape: f32[2,8,128], index: 2, kind: output, shape index: {}]  }
   0x1   :  { %s444_s11 = smov 0  }
   0x2 LB: > { %s21_s12 = sadd.s32 1, %s419_s10  ;;  %p364_p0 = scmp.ge.s32.totalorder %s423_s11, 1  ;;  %s423_s11 = sphi %s444_s11, %s12_s11   ;;  %s419_s10 = sphi %s442_s10, %s508_s10   ;;  %s415_s9 = sphi %s440_s9, %s507_s9  }
   0x3   : > { %p22_p1 = scmp.ge.s32.totalorder %s21_s12, 2  ;;  %p139_p2 = scmp.lt.s32.totalorder %s423_s11, 3 }
   0x5   : > { %s510_s12 = smov (%p22_p1, %s21_s12), 0  ;;  %p140_p3 = pnand %p364_p0, %p139_p2 }
   0x6   : > { %p169_p4 = scmp.lt.s32.totalorder (!%p140_p3), %s415_s9, 1 }
   0x7   : > { %143 = sbr.rel (%p140_p3) target bundleno = 30 (0x1e), region = 28 }
   0xc   : > { %s512_s9 = smov (!%p169_p4, %s415_s9), 1  ;;  %v189_v0 = vld [vmem:[%s505_s1] sm:$0xf]  ;;  %v190_v1 = vld [vmem:[%s505_s1 + $0x10] sm:$0xf] }
   0xd   : > { %v209_v2 = vld [vmem:[%s505_s1 + $0x4] sm:$0xf]  ;;  %s365_s19 = sshll.u32 %s512_s9, 3  ;;  %v210_v3 = vld [vmem:[%s505_s1 + $0x14] sm:$0xf] }
   0xe   : > { %v229_v4 = vld [vmem:[%s505_s1 + $0x8] sm:$0xf]  ;;  %s175_s26 = scalar_lea.vmem %s504_s0, %s365_s19  ;;  %v230_v5 = vld [vmem:[%s505_s1 + $0x18] sm:$0xf]  ;;  %v249_v6 = vld [vmem:[%s505_s1 + $0xc] sm:$0xf]  ;;  %s186_s7 = scalar_lea.vmem %s506_s2, %s365_s19 }
   0xf   : > { %v250_v7 = vld [vmem:[%s505_s1 + $0x1c] sm:$0xf]  ;;  %v367_v8 = vld [vmem:[%s175_s26] ss:$0 sm:$0xff]  ;;  %v368_v9 = vld [vmem:[%s175_s26 + $0x4] ss:$0 sm:$0xff] }
  0x10   : > { %v369_v10 = vld [vmem:[%s175_s26 + $0x1] ss:$0 sm:$0xff]  ;;  %v199_v11 = vmul.f32 %v367_v8, %v189_v0  ;;  %v200_v12 = vmul.f32 %v368_v9, %v190_v1  ;;  %v370_v13 = vld [vmem:[%s175_s26 + $0x5] ss:$0 sm:$0xff]  ;;  %v371_v15 = vld [vmem:[%s175_s26 + $0x2] ss:$0 sm:$0xff]  ;;  %v203_v17 = vmul.f32 %v367_v8, %v190_v1  ;;  %v204_v23 = vmul.f32 %v368_v9, %v189_v0 }
  0x11   : > { %v219_v14 = vmul.f32 %v369_v10, %v209_v2  ;;  %v372_v16 = vld [vmem:[%s175_s26 + $0x6] ss:$0 sm:$0xff]  ;;  %v220_v18 = vmul.f32 %v370_v13, %v210_v3  ;;  %v239_v19 = vmul.f32 %v371_v15, %v229_v4  ;;  %v373_v21 = vld [vmem:[%s175_s26 + $0x3] ss:$0 sm:$0xff]  ;;  %v374_v22 = vld [vmem:[%s175_s26 + $0x7] ss:$0 sm:$0xff]  ;;  %v223_v27 = vmul.f32 %v369_v10, %v210_v3 }
  0x12   : > { %v240_v20 = vmul.f32 %v372_v16, %v230_v5  ;;  %v201_v24 = vsub.f32 %v199_v11, %v200_v12  ;;  %v259_v25 = vmul.f32 %v373_v21, %v249_v6  ;;  %v260_v26 = vmul.f32 %v374_v22, %v250_v7 }
  0x13   : > { %v221_v28 = vsub.f32 %v219_v14, %v220_v18  ;;  %v205_v30 = vadd.f32 %v204_v23, %v203_v17  ;;  %v224_v31 = vmul.f32 %v370_v13, %v209_v2  ;;  %v243_v32 = vmul.f32 %v371_v15, %v230_v5 }
  0x14   : > { %v241_v29 = vsub.f32 %v239_v19, %v240_v20  ;;  %v244_v33 = vmul.f32 %v372_v16, %v229_v4  ;;  %v263_v34 = vmul.f32 %v373_v21, %v250_v7  ;;  %v261_v36 = vsub.f32 %v259_v25, %v260_v26 }
  0x15   : > { %v222_v35 = vadd.f32 %v221_v28, %v201_v24  ;;  %v225_v37 = vadd.f32 %v224_v31, %v223_v27  ;;  %v264_v38 = vmul.f32 %v374_v22, %v249_v6 }
  0x16   : > { %v245_v39 = vadd.f32 %v244_v33, %v243_v32 }
  0x17   : > { %v242_v40 = vadd.f32 %v241_v29, %v222_v35  ;;  %v226_v41 = vadd.f32 %v225_v37, %v205_v30  ;;  %v265_v42 = vadd.f32 %v264_v38, %v263_v34 }
  0x19   : > { %v262_v43 = vadd.f32 %v261_v36, %v242_v40  ;;  %v246_v44 = vadd.f32 %v245_v39, %v226_v41 }
  0x1b   : > { %267 = vst [vmem:[%s186_s7] sm:$0xf] %v262_v43  ;;  %v266_v45 = vadd.f32 %v265_v42, %v246_v44 }
  0x1d   : > { %268 = vst [vmem:[%s186_s7 + $0x4] sm:$0xf] %v266_v45 }
  0x1e PF: > { %s12_s11 = sadd.s32 1, %s423_s11   ;;  %s507_s9 = smov %s419_s10 }
  0x1f   : > { %p9_p5 = scmp.ge.s32.totalorder %s12_s11, 4   ;;  %s508_s10 = smov %s510_s12 }
  0x21   :  { %11 = sbr.rel (!%p9_p5) target bundleno = 2 (0x2), region = 61 }

// kernel: operator_block_3d.5
= control target key start
LH: loop header
LB: loop body
LE: loop exit
PB: predicated region body
PF: predicated region fallthrough
CT: control target
= control target key end

     0   :  { %s238_s0 = inlined_call_operand.vmem [shape: f32[8,512], index: 0, kind: input, shape index: {}]   ;;  %s239_s1 = inlined_call_operand.vmem [shape: f32[8,512], index: 1, kind: input, shape index: {}]   ;;  %s240_s2 = inlined_call_operand.vmem [shape: f32[8,512], index: 2, kind: output, shape index: {}]  }
   0x1   :  { %v11_v0 = vld [vmem:[%s238_s0] sm:$0xff]  ;;  %v12_v2 = vld [vmem:[%s238_s0 + $0x8] sm:$0xff]  ;;  %v13_v5 = vld [vmem:[%s238_s0 + $0x10] sm:$0xff] }
   0x2   :  { %v15_v1 = vld [vmem:[%s239_s1] sm:$0xff]  ;;  %v16_v4 = vld [vmem:[%s239_s1 + $0x8] sm:$0xff]  ;;  %v17_v6 = vld [vmem:[%s239_s1 + $0x10] sm:$0xff] }
   0x3   :  { %v179_v3 = vadd.f32 %v15_v1, %v11_v0  ;;  %v190_v7 = vadd.f32 %v16_v4, %v12_v2  ;;  %v192_v8 = vadd.f32 %v17_v6, %v13_v5  ;;  %v14_v9 = vld [vmem:[%s238_s0 + $0x18] sm:$0xff] }
   0x4   :  { %v18_v10 = vld [vmem:[%s239_s1 + $0x18] sm:$0xff] }
   0x5   :  { %v201_v11 = vmul.f32 0.70710677, %v179_v3  ;;  %v203_v12 = vadd.f32 %v18_v10, %v14_v9  ;;  %v206_v13 = vmul.f32 0.70710677, %v190_v7  ;;  %v209_v14 = vmul.f32 0.70710677, %v192_v8 }
   0x7   :  { %v27_v15 = vand.u32 2147483647, %v201_v11  ;;  %v213_v16 = vmul.f32 0.70710677, %v203_v12  ;;  %v28_v17 = vand.u32 2147483647, %v206_v13 }
   0x8   :  { %v29_v18 = vand.u32 2147483647, %v209_v14  ;;  %vm107_vm0 = vcmp.ge.f32.partialorder %v201_v11, 0.0  ;;  %vm108_vm1 = vcmp.ge.f32.partialorder %v206_v13, 0.0  ;;  %vm109_vm2 = vcmp.ge.f32.partialorder %v209_v14, 0.0 }
   0x9   :  { %v31_v19 = vmul.f32 0.3275911, %v27_v15  ;;  %v30_v20 = vand.u32 2147483647, %v213_v16  ;;  %v32_v21 = vmul.f32 0.3275911, %v28_v17 }
   0xa   :  { %v33_v22 = vmul.f32 0.3275911, %v29_v18  ;;  %v83_v28 = vsub.f32 0.0, %v27_v15  ;;  %v84_v29 = vsub.f32 0.0, %v28_v17  ;;  %v85_v31 = vsub.f32 0.0, %v29_v18 }
   0xb   :  { %v35_v23 = vadd.f32 1.0, %v31_v19  ;;  %v34_v24 = vmul.f32 0.3275911, %v30_v20  ;;  %v36_v25 = vadd.f32 1.0, %v32_v21  ;;  %v86_v33 = vsub.f32 0.0, %v30_v20 }
   0xc   :  { %v37_v26 = vadd.f32 1.0, %v33_v22  ;;  %v87_v30 = vmul.f32 %v83_v28, %v27_v15  ;;  %v88_v32 = vmul.f32 %v84_v29, %v28_v17  ;;  %v89_v35 = vmul.f32 %v85_v31, %v29_v18 }
   0xd   :  { %139 = vrcp.f32 %v35_v23  ;;  %v38_v27 = vadd.f32 1.0, %v34_v24  ;;  %v90_v40 = vmul.f32 %v86_v33, %v30_v20  ;;  %v121_v13 = vmul.f32 0.5, %v192_v8 }
   0xe   :  { %141 = vrcp.f32 %v36_v25  ;;  %v91_v34 = vmul.f32 1.442695, %v87_v30  ;;  %v93_v37 = vmul.f32 1.442695, %v88_v32  ;;  %v95_v43 = vmul.f32 1.442695, %v89_v35 }
   0xf   :  { %143 = vrcp.f32 %v37_v26  ;;  %v97_v48 = vmul.f32 1.442695, %v90_v40  ;;  %vm110_vm3 = vcmp.ge.f32.partialorder %v213_v16, 0.0 }
  0x10   :  { %145 = vrcp.f32 %v38_v27 }
  0x11   :  { %147 = vpow2.f32 %v91_v34  ;;  %v119_v34 = vmul.f32 0.5, %v179_v3 }
  0x12   :  { %149 = vpow2.f32 %v93_v37  ;;  %v120_v37 = vmul.f32 0.5, %v190_v7 }
  0x13   :  { %151 = vpow2.f32 %v95_v43 }
  0x14   :  { %153 = vpow2.f32 %v97_v48 }
  0x1a   :  { %v140_v36 = vpop.eup %139 }
  0x1b   :  { %v142_v38 = vpop.eup %141  ;;  %v47_v39 = vmul.f32 1.0614054, %v140_v36 }
  0x1c   :  { %v48_v41 = vmul.f32 1.0614054, %v142_v38  ;;  %v144_v44 = vpop.eup %143 }
  0x1d   :  { %v51_v42 = vadd.f32 -1.4531521, %v47_v39  ;;  %v49_v47 = vmul.f32 1.0614054, %v144_v44  ;;  %v146_v49 = vpop.eup %145 }
  0x1e   :  { %v52_v45 = vadd.f32 -1.4531521, %v48_v41  ;;  %v50_v53 = vmul.f32 1.0614054, %v146_v49  ;;  %v148_v9 = vpop.eup %147 }
  0x1f   :  { %v55_v46 = vmul.f32 %v140_v36, %v51_v42  ;;  %v53_v52 = vadd.f32 -1.4531521, %v49_v47  ;;  %v150_v15 = vpop.eup %149  ;;  %v122_v47 = vmul.f32 0.5, %v203_v12 }
  0x20   :  { %v56_v50 = vmul.f32 %v142_v38, %v52_v45  ;;  %v54_v57 = vadd.f32 -1.4531521, %v50_v53  ;;  %v152_v24 = vpop.eup %151 }
  0x21   :  { %v59_v51 = vadd.f32 1.4214138, %v55_v46  ;;  %v57_v56 = vmul.f32 %v144_v44, %v53_v52  ;;  %v154_v29 = vpop.eup %153 }
  0x22   :  { %v60_v54 = vadd.f32 1.4214138, %v56_v50  ;;  %v58_v61 = vmul.f32 %v146_v49, %v54_v57 }
  0x23   :  { %v63_v55 = vmul.f32 %v140_v36, %v59_v51  ;;  %v61_v60 = vadd.f32 1.4214138, %v57_v56 }
  0x24   :  { %v64_v58 = vmul.f32 %v142_v38, %v60_v54  ;;  %v62_v1 = vadd.f32 1.4214138, %v58_v61 }
  0x25   :  { %v67_v59 = vadd.f32 -0.28449672, %v63_v55  ;;  %v65_v0 = vmul.f32 %v144_v44, %v61_v60 }
  0x26   :  { %v68_v62 = vadd.f32 -0.28449672, %v64_v58  ;;  %v66_v6 = vmul.f32 %v146_v49, %v62_v1 }
  0x27   :  { %v71_v63 = vmul.f32 %v140_v36, %v67_v59  ;;  %v69_v5 = vadd.f32 -0.28449672, %v65_v0 }
  0x28   :  { %v72_v2 = vmul.f32 %v142_v38, %v68_v62  ;;  %v70_v19 = vadd.f32 -0.28449672, %v66_v6 }
  0x29   :  { %v75_v4 = vadd.f32 0.2548296, %v71_v63  ;;  %v73_v18 = vmul.f32 %v144_v44, %v69_v5 }
  0x2a   :  { %v76_v10 = vadd.f32 0.2548296, %v72_v2  ;;  %v74_v23 = vmul.f32 %v146_v49, %v70_v19 }
  0x2b   :  { %v79_v17 = vmul.f32 %v140_v36, %v75_v4  ;;  %v77_v22 = vadd.f32 0.2548296, %v73_v18 }
  0x2c   :  { %v80_v20 = vmul.f32 %v142_v38, %v76_v10  ;;  %v78_v28 = vadd.f32 0.2548296, %v74_v23 }
  0x2d   :  { %v99_v21 = vmul.f32 %v148_v9, %v79_v17  ;;  %v81_v27 = vmul.f32 %v144_v44, %v77_v22 }
  0x2e   :  { %v100_v25 = vmul.f32 %v150_v15, %v80_v20  ;;  %v82_v33 = vmul.f32 %v146_v49, %v78_v28 }
  0x2f   :  { %v103_v26 = vsub.f32 1.0, %v99_v21  ;;  %v101_v32 = vmul.f32 %v152_v24, %v81_v27 }
  0x30   :  { %v104_v30 = vsub.f32 1.0, %v100_v25  ;;  %v102_v39 = vmul.f32 %v154_v29, %v82_v33 }
  0x31   :  { %v111_v31 = vsub.f32 0.0, %v103_v26  ;;  %v105_v38 = vsub.f32 1.0, %v101_v32 }
  0x32   :  { %v112_v35 = vsub.f32 0.0, %v104_v30  ;;  %v106_v43 = vsub.f32 1.0, %v102_v39 }
  0x33   :  { %v115_v36 = vsel %vm107_vm0, %v103_v26, %v111_v31  ;;  %v113_v11 = vsub.f32 0.0, %v105_v38 }
  0x34   :  { %v123_v40 = vadd.f32 1.0, %v115_v36  ;;  %v116_v41 = vsel %vm108_vm1, %v104_v30, %v112_v35  ;;  %v114_v46 = vsub.f32 0.0, %v106_v43 }
  0x35   :  { %v124_v42 = vadd.f32 1.0, %v116_v41  ;;  %v117_v3 = vsel %vm109_vm2, %v105_v38, %v113_v11 }
  0x36   :  { %v127_v44 = vmul.f32 %v123_v40, %v119_v34  ;;  %v125_v7 = vadd.f32 1.0, %v117_v3  ;;  %v118_v14 = vsel %vm110_vm3, %v106_v43, %v114_v46 }
  0x37   :  { %v128_v45 = vmul.f32 %v124_v42, %v120_v37  ;;  %v126_v49 = vadd.f32 1.0, %v118_v14 }
  0x38   :  { %131 = vst [vmem:[%s240_s2] sm:$0xff] %v127_v44  ;;  %v129_v48 = vmul.f32 %v125_v7, %v121_v13 }
  0x39   :  { %132 = vst [vmem:[%s240_s2 + $0x8] sm:$0xff] %v128_v45  ;;  %v130_v8 = vmul.f32 %v126_v49, %v122_v47 }
  0x3a   :  { %133 = vst [vmem:[%s240_s2 + $0x10] sm:$0xff] %v129_v48 }
  0x3b   :  { %134 = vst [vmem:[%s240_s2 + $0x18] sm:$0xff] %v130_v8 }

</bundles_post_ra>
